<compile_context>
chip_gen: v5e
topology: v5e:2x2
jax: 0.10.0
libtpu: 0.0.40
codegen_flags: <defaults>
</compile_context>

<pallas_src>
import numpy as np

import jax
import jax.numpy as jnp
from jax.experimental import pallas as pl
from jax.experimental.pallas import tpu as pltpu


# ----------------------------------------------------------------------------
# Kernel: x (rows, T*D) + pe (1, T*D) broadcast over the batch (sublane) axis.
# ----------------------------------------------------------------------------
def add_pe_kernel(x_ref, pe_ref, o_ref):
    o_ref[...] = x_ref[...] + pe_ref[...]


# ----------------------------------------------------------------------------
# PE table (matches the PyTorch buffer construction exactly)
# ----------------------------------------------------------------------------
def positional_encoding_table(max_seq_len, d_model):
    assert d_model % 2 == 0, "d_model must be even (as the PyTorch module assumes)"
    pos = np.arange(max_seq_len, dtype=np.float32)[:, None]
    two_i = np.arange(0, d_model, 2, dtype=np.float32)
    div = np.power(10000.0, two_i / float(d_model))
    pe = np.zeros((max_seq_len, d_model), np.float32)
    pe[:, 0::2] = np.sin(pos / div)
    pe[:, 1::2] = np.cos(pos / div)
    return jnp.asarray(pe)


# ----------------------------------------------------------------------------
# Wrapper: PositionalEncoder.forward (inference mode)
# ----------------------------------------------------------------------------
_SUBLANE_FOR_ITEMSIZE = {4: 8, 2: 16, 1: 32}


def positional_encoder_forward(x, pe_table, *, tile_b=None):
    B, T, D = x.shape
    dtype = x.dtype
    itemsize = jnp.dtype(dtype).itemsize

    # Fold (T, D) into the lane axis -> lane-dense last dim, and keep PE as a
    # single un-repeated row (1/B of the naive PE HBM traffic).
    x_flat = x.reshape(B, T * D)
    pe_flat = pe_table[:T, :].astype(dtype).reshape(1, T * D)

    cost = pl.CostEstimate(
        flops=B * T * D,
        transcendentals=0,
        bytes_accessed=(2 * B * T * D + T * D) * itemsize,
    )

    if tile_b is None:
        # x-tile budget sized for v7x (64 MiB physical / 32 MiB default scoped
        # VMEM): double-buffered x + out tiles + resident PE row -> keep the
        # x tile around 4 MiB (total ~16 MiB with headroom). v5e/v6e (128 MiB)
        # simply get the same comfortable tile.
        x_tile_budget = 4 * 1024 * 1024
        row_bytes = T * D * itemsize
        sublane = _SUBLANE_FOR_ITEMSIZE.get(itemsize, 8)
        tile_b = max(sublane, (x_tile_budget // row_bytes) // sublane * sublane)

    if tile_b >= B:
        # Small case: whole problem fits in VMEM -> no grid loop at all.
        out = pl.pallas_call(
            add_pe_kernel,
            in_specs=[
                pl.BlockSpec(memory_space=pltpu.MemorySpace.VMEM),
                pl.BlockSpec(memory_space=pltpu.MemorySpace.VMEM),
            ],
            out_specs=pl.BlockSpec(memory_space=pltpu.MemorySpace.VMEM),
            out_shape=jax.ShapeDtypeStruct((B, T * D), dtype),
            input_output_aliases={0: 0},
            cost_estimate=cost,
        )(x_flat, pe_flat)
    else:
        # Large case: tile over the batch/row axis; PE index_map is constant so
        # the PE row is fetched once and stays resident across grid steps.
        out = pl.pallas_call(
            add_pe_kernel,
            grid=(pl.cdiv(B, tile_b),),
            in_specs=[
                pl.BlockSpec((tile_b, T * D), lambda i: (i, 0)),
                pl.BlockSpec((1, T * D), lambda i: (0, 0)),
            ],
            out_specs=pl.BlockSpec((tile_b, T * D), lambda i: (i, 0)),
            out_shape=jax.ShapeDtypeStruct((B, T * D), dtype),
            input_output_aliases={0: 0},
            cost_estimate=cost,
            compiler_params=pltpu.CompilerParams(
                dimension_semantics=("parallel",)),
        )(x_flat, pe_flat)

    return out.reshape(B, T, D)


# ----------------------------------------------------------------------------
# Pure-JAX reference (mirrors the PyTorch forward, eval mode)
# ----------------------------------------------------------------------------
def ref_positional_encoder(x, pe_table):
    B, T, D = x.shape
    one_batch_pe = pe_table[:T, :].astype(x.dtype)[None]       # (1, T, D)
    repeated_pe = jnp.broadcast_to(one_batch_pe, (B, T, D))
    return x + repeated_pe                                      # dropout = identity (eval)


# ----------------------------------------------------------------------------
if __name__ == "__main__":
    MAX_SEQ_LEN = 200
    B, T, D = 2, 8, 32          # batch, seq len, d_model

    key = jax.random.PRNGKey(0)
    pe_table = positional_encoding_table(MAX_SEQ_LEN, D)

    # --- primary check: small f32 problem (no-grid, whole-array VMEM path) ---
    x = jax.random.normal(key, (B, T, D), jnp.float32)
    ref = jax.block_until_ready(ref_positional_encoder(x, pe_table))
    out = jax.block_until_ready(positional_encoder_forward(x, pe_table))
    assert out.shape == (B, T, D), out.shape
    assert out.dtype == x.dtype, out.dtype
    assert np.allclose(np.asarray(out), np.asarray(ref), atol=1e-6, rtol=1e-6), (
        "f32 mismatch vs reference: max abs err = %g"
        % float(np.max(np.abs(np.asarray(out) - np.asarray(ref)))))

    # --- dtype-generic check: bf16 activations run through the same kernel ---
    xb = x.astype(jnp.bfloat16)
    refb = jax.block_until_ready(ref_positional_encoder(xb, pe_table))
    outb = jax.block_until_ready(positional_encoder_forward(xb, pe_table))
    assert outb.dtype == jnp.bfloat16, outb.dtype
    assert np.allclose(np.asarray(outb.astype(jnp.float32)),
                       np.asarray(refb.astype(jnp.float32)),
                       atol=1e-2, rtol=1e-2), "bf16 mismatch vs reference"

    # --- batch-tiled grid path (forced small tile to exercise it) ---
    B2 = 32
    x2 = jax.random.normal(jax.random.PRNGKey(1), (B2, T, D), jnp.float32)
    ref2 = jax.block_until_ready(ref_positional_encoder(x2, pe_table))
    out2 = jax.block_until_ready(
        positional_encoder_forward(x2, pe_table, tile_b=8))
    assert np.allclose(np.asarray(out2), np.asarray(ref2), atol=1e-6, rtol=1e-6), (
        "tiled-path mismatch vs reference")

    print("KERNEL_OK")
</pallas_src>

<mosaic_0001>
module attributes {stable_mosaic.version = 11 : i64} {
  func.func @add_pe_kernel(%arg0: memref<2x256xf32, #tpu.memory_space<vmem>>, %arg1: memref<1x256xf32, #tpu.memory_space<vmem>>, %arg2: memref<2x256xf32, #tpu.memory_space<vmem>>) attributes {dimension_semantics = [], scalar_prefetch = 0 : i64, scratch_operands = 0 : i64, tpu.core_type = #tpu.core_type<tc>} {
    %c0 = arith.constant 0 : index
    %c0_0 = arith.constant 0 : index
    %0 = vector.load %arg0[%c0, %c0_0] : memref<2x256xf32, #tpu.memory_space<vmem>>, vector<2x256xf32>
    %c0_1 = arith.constant 0 : index
    %c0_2 = arith.constant 0 : index
    %1 = vector.load %arg1[%c0_1, %c0_2] : memref<1x256xf32, #tpu.memory_space<vmem>>, vector<1x256xf32>
    %2 = vector.broadcast %1 : vector<1x256xf32> to vector<2x256xf32>
    %3 = arith.addf %0, %2 : vector<2x256xf32>
    %c0_3 = arith.constant 0 : index
    %c0_4 = arith.constant 0 : index
    %4 = vector.load %arg2[%c0_3, %c0_4] : memref<2x256xf32, #tpu.memory_space<vmem>>, vector<2x256xf32>
    tpu.vector_store %arg2[%c0_3, %c0_4], %3 {strides = array<i32>} : memref<2x256xf32, #tpu.memory_space<vmem>>, vector<2x256xf32>,
    return
  }
}

</mosaic_0001>

<bundles_post_ra>
// kernel: tpu_custom_call.1
= control target key start
LH: loop header
LB: loop body
LE: loop exit
PB: predicated region body
PF: predicated region fallthrough
CT: control target
= control target key end

     0   :  { %7 = vsyncpa [#allocation3], 0  ;;  %s134_s0 = inlined_call_operand.hbm [shape: f32[2,256], index: 0, kind: input, shape index: {}, may-alias: {0,2}]   ;;  %s135_s1 = inlined_call_operand.vmem [shape: f32[1,256], index: 1, kind: input, shape index: {}]   ;;  %s136_s2 = inlined_call_operand.hbm [shape: f32[2,256], index: 2, kind: output, shape index: {}, may-alias: {0,2}]  }
   0x1   :  { %8 = vsyncpa [#allocation4], 0  ;;  %s14_s11 = sshll.u32 %s134_s0, 4  ;;  %s108_s12 = smov [#allocation2]   ;;  %s15_s11 = int_to_ptr.hbm [resolvable:$true] %s14_s11 }
   0x2   :  { %s16_s13 = sshll.u32 %s108_s12, 4  ;;  %s17_s13 = int_to_ptr.vmem [resolvable:$true] %s16_s13 }
   0x3   :  { %19 = dma.hbm_to_vmem [thread:$0]  %s15_s11, 64, %s17_s13, [#allocation3]  }
   0x4   :  { %104 = dma.done.wait [#allocation3], 64  }
   0x5   :  { %105 = vsyncadd [#allocation3], 4294967232  ;;  %v27_v0 = vld [vmem:[%s135_s1] sm:$0x3]  ;;  %vm32_vm0 = vcmask 1041408   ;;  %s109_s16 = smov [#allocation5]  }
   0x6   :  { %v29_v1 = vperm.slane %v27_v0, 0  ;;  %v30_v2 = vperm.slane %v27_v0, 1  ;;  %v26_v3 = vld [vmem:[#allocation2] sm:$0xf]  ;;  %s42_s17 = sshll.u32 %s109_s16, 4  ;;  %s44_s19 = sshll.u32 %s136_s2, 4  ;;  %s43_s17 = int_to_ptr.vmem [resolvable:$true] %s42_s17  ;;  %s45_s19 = int_to_ptr.hbm [resolvable:$true] %s44_s19 }
   0x8   :  { %v31_v4 = vrot.slane %v30_v2, 6 }
   0xa   :  { %v33_v5 = vsel %vm32_vm0, %v29_v1, %v31_v4 }
   0xb   :  { %v35_v6 = vadd.f32 %v33_v5, %v26_v3 }
   0xd   :  { %36 = vst [vmem:[#allocation5] sm:$0xf] %v35_v6 }
   0xe   :  { %47 = dma.vmem_to_hbm [thread:$0]  %s43_s17, 64, %s45_s19, [#allocation4]  }
   0xf   :  { %106 = dma.done.wait [#allocation4], 64  }
  0x10   :  { %107 = vsyncadd [#allocation4], 4294967232 }
  0x11   :  { %52 = vsyncpa [#allocation3], 1 }
  0x12   :  { %53 = vsyncpa [#allocation4], 1 }

</bundles_post_ra>
